<compile_context>
chip_gen: v5e
topology: v5e:2x2
jax: 0.10.0
libtpu: 0.0.40
codegen_flags: <defaults>
</compile_context>

<pallas_src>
import jax
import jax.numpy as jnp
from jax.experimental import pallas as pl
from jax.experimental.pallas import tpu as pltpu

H_IN, W_IN = 40, 40
K = 5
H_OUT, W_OUT = H_IN - K + 1, W_IN - K + 1      # 36, 36
N_PIX = H_OUT * W_OUT                          # 1296
FC1_OUT, FC2_OUT, FC3_OUT = 160, 20, 2
BN_EPS = 1e-5

# Packed-scalar layout inside the single (32,) f32 SMEM argument:
#   [0:25)  conv weight, row-major (index = di*K + dj)
#   [25]    conv bias
#   [26]    folded head bias, output 0
#   [27]    folded head bias, output 1
#   [28:32) padding
SC_WC0, SC_BC, SC_BIAS0, SC_BIAS1, SC_LEN = 0, 25, 26, 27, 32


def mynn_kernel(sc_ref, x_ref, wm_ref, out_ref):
    # ---- Conv2d(1, 1, 5), valid padding ----
    # dj outer: one 36-lane-wide load per dj (5 lane alignments total); the 5
    # di taps only need sublane slices of that loaded value.  One independent
    # partial accumulator per dj keeps VALU dependency chains short.
    partials = []
    for dj in range(K):
        x_dj = x_ref[:, dj:dj + W_OUT]                                 # (40, 36)
        if dj == 0:
            acc = jnp.full((H_OUT, W_OUT), sc_ref[SC_BC], jnp.float32)  # conv bias folded in
            acc = acc + x_dj[0:H_OUT, :] * sc_ref[SC_WC0 + dj]          # di = 0 tap
        else:
            acc = x_dj[0:H_OUT, :] * sc_ref[SC_WC0 + dj]                # di = 0 tap
        for di in range(1, K):
            acc = acc + x_dj[di:di + H_OUT, :] * sc_ref[SC_WC0 + di * K + dj]
        partials.append(acc)
    conv = (partials[0] + partials[1]) + (partials[2] + partials[3]) + partials[4]

    # ---- ReLU ----
    r = jnp.maximum(conv, 0.0)

    # ---- BatchNorm2d(1) batch statistics (train mode), centered two-pass
    #      variance (robust against cancellation when var << mean^2). ----
    inv_n = 1.0 / float(N_PIX)
    mean = jnp.sum(r) * inv_n
    d = r - mean
    var = jnp.sum(d * d) * inv_n
    inv_std = jax.lax.rsqrt(var + BN_EPS)

    # ---- Fully folded BN-affine + fc1 -> fc2 -> fc3 head.  Mean subtraction
    # is already folded into wm (each map sums to zero), so each output is a
    # single weighted full reduction. ----
    s0 = jnp.sum(r * wm_ref[0])
    s1 = jnp.sum(r * wm_ref[1])
    out_ref[0, 0] = inv_std * s0 + sc_ref[SC_BIAS0]
    out_ref[0, 1] = inv_std * s1 + sc_ref[SC_BIAS1]


def init_params(key):
    """Parameters in PyTorch layout (Linear weights are (out_features, in_features))."""
    ks = jax.random.split(key, 8)
    s = 0.05
    wc = jax.random.normal(ks[0], (K, K), jnp.float32) * s              # Conv2d(1,1,5).weight[0,0]
    bc = jax.random.normal(ks[1], (1,), jnp.float32) * s                # Conv2d bias
    gamma = jnp.ones((1,), jnp.float32)                                 # BatchNorm2d affine defaults
    beta = jnp.zeros((1,), jnp.float32)
    w1 = jax.random.normal(ks[2], (FC1_OUT, N_PIX), jnp.float32) * s    # fc1.weight
    b1 = jax.random.normal(ks[3], (FC1_OUT,), jnp.float32) * s
    w2 = jax.random.normal(ks[4], (FC2_OUT, FC1_OUT), jnp.float32) * s  # fc2.weight
    b2 = jax.random.normal(ks[5], (FC2_OUT,), jnp.float32) * s
    w3 = jax.random.normal(ks[6], (FC3_OUT, FC2_OUT), jnp.float32) * s  # fc3.weight
    b3 = jax.random.normal(ks[7], (FC3_OUT,), jnp.float32) * s
    return (wc, bc, gamma, beta, w1, b1, w2, b2, w3, b3)


def fold_params(params):
    """Host-side exact folding of fc1@fc2@fc3 (+ BN affine + mean term) into kernel inputs."""
    wc, bc, gamma, beta, w1, b1, w2, b2, w3, b3 = params
    hp = jax.lax.Precision.HIGHEST
    a_head = jnp.dot(jnp.dot(w3, w2, precision=hp), w1, precision=hp).T     # (1296, 2)
    b_head = (jnp.dot(jnp.dot(b1, w2.T, precision=hp), w3.T, precision=hp)
              + jnp.dot(b2, w3.T, precision=hp) + b3)                       # (2,)
    a_colsum = jnp.sum(a_head, axis=0)                                      # (2,)
    # Fold the mean subtraction into the weight maps: each column sums to 0,
    # so in-kernel:  sum(r * wm_o) == gamma * sum((r - mean) * a_o).
    wm = gamma[0] * (a_head - a_colsum[None, :] / float(N_PIX))             # (1296, 2)
    # Row-major flat index h*36+w matches PyTorch's x.view(1, -1).
    wmaps = wm.T.reshape(FC3_OUT, H_OUT, W_OUT)                             # (2, 36, 36)
    bias = beta[0] * a_colsum + b_head                                      # (2,)

    scalars = jnp.zeros((SC_LEN,), jnp.float32)
    scalars = scalars.at[SC_WC0:SC_WC0 + K * K].set(wc.reshape(-1))
    scalars = scalars.at[SC_BC].set(bc[0])
    scalars = scalars.at[SC_BIAS0].set(bias[0])
    scalars = scalars.at[SC_BIAS1].set(bias[1])
    return (scalars, wmaps)


def mynn_forward(x_nchw, folded):
    """x_nchw: (1, 1, 40, 40) f32 -> (1, 2) f32."""
    scalars, wmaps = folded
    x = x_nchw[0, 0]                                                        # (40, 40)
    smem = pl.BlockSpec(memory_space=pltpu.MemorySpace.SMEM)
    vmem = pl.BlockSpec(memory_space=pltpu.MemorySpace.VMEM)
    cost = pl.CostEstimate(
        flops=2 * K * K * N_PIX + 8 * N_PIX,
        transcendentals=1,
        bytes_accessed=4 * (H_IN * W_IN + FC3_OUT * N_PIX + SC_LEN + FC3_OUT),
    )
    return pl.pallas_call(
        mynn_kernel,
        out_shape=jax.ShapeDtypeStruct((1, FC3_OUT), jnp.float32),
        in_specs=[smem, vmem, vmem],
        out_specs=smem,
        cost_estimate=cost,
    )(scalars, x, wmaps)


def mynn_reference(x_nchw, params):
    """Pure-JAX layer-by-layer reference of the PyTorch module (train-mode BN)."""
    wc, bc, gamma, beta, w1, b1, w2, b2, w3, b3 = params
    hp = jax.lax.Precision.HIGHEST
    x = x_nchw[0, 0]
    c = jnp.zeros((H_OUT, W_OUT), jnp.float32)
    for di in range(K):
        for dj in range(K):
            c = c + x[di:di + H_OUT, dj:dj + W_OUT] * wc[di, dj]
    r = jnp.maximum(c + bc[0], 0.0)
    mean = jnp.mean(r)
    var = jnp.mean((r - mean) ** 2)                      # biased, as torch BN uses for normalization
    y = gamma[0] * (r - mean) * jax.lax.rsqrt(var + BN_EPS) + beta[0]
    f = y.reshape(1, -1)
    h1 = jnp.dot(f, w1.T, precision=hp) + b1
    h2 = jnp.dot(h1, w2.T, precision=hp) + b2
    return jnp.dot(h2, w3.T, precision=hp) + b3
    # TODO(synk): BatchNorm running-stat updates (training side effect) are not modeled.


if __name__ == "__main__":
    root = jax.random.PRNGKey(0)
    pkey, xkey = jax.random.split(root)
    params = init_params(pkey)
    x = jax.random.normal(xkey, (1, 1, H_IN, W_IN), jnp.float32)

    folded = fold_params(params)        # one-time, mathematically exact fold
    out = mynn_forward(x, folded)
    out = jax.block_until_ready(out)
    assert out.shape == (1, FC3_OUT) and out.dtype == jnp.float32

    ref = mynn_reference(x, params)
    err = float(jnp.max(jnp.abs(out - ref)))
    assert err < 1e-3, f"kernel mismatch vs reference: max abs err = {err}"
    print("KERNEL_OK")
</pallas_src>

<mosaic_0001>
module attributes {stable_mosaic.version = 11 : i64} {
  func.func @mynn_kernel(%arg0: memref<32xf32, #tpu.memory_space<smem>>, %arg1: memref<40x40xf32, #tpu.memory_space<vmem>>, %arg2: memref<2x36x36xf32, #tpu.memory_space<vmem>>, %arg3: memref<1x2xf32, #tpu.memory_space<smem>>) attributes {dimension_semantics = [], scalar_prefetch = 0 : i64, scratch_operands = 0 : i64, tpu.core_type = #tpu.core_type<tc>} {
    %c0 = arith.constant 0 : index
    %c0_0 = arith.constant 0 : index
    %0 = vector.load %arg1[%c0, %c0_0] : memref<40x40xf32, #tpu.memory_space<vmem>>, vector<40x36xf32>
    %c25 = arith.constant 25 : index
    %1 = memref.load %arg0[%c25] : memref<32xf32, #tpu.memory_space<smem>>
    %2 = vector.broadcast %1 : f32 to vector<36x36xf32>
    %3 = vector.extract_strided_slice %0 {offsets = [0, 0], sizes = [36, 36], strides = [1, 1]} : vector<40x36xf32> to vector<36x36xf32>
    %c0_1 = arith.constant 0 : index
    %4 = memref.load %arg0[%c0_1] : memref<32xf32, #tpu.memory_space<smem>>
    %5 = vector.broadcast %4 : f32 to vector<36x36xf32>
    %6 = arith.mulf %3, %5 : vector<36x36xf32>
    %7 = arith.addf %2, %6 : vector<36x36xf32>
    %8 = vector.extract_strided_slice %0 {offsets = [1, 0], sizes = [36, 36], strides = [1, 1]} : vector<40x36xf32> to vector<36x36xf32>
    %c5 = arith.constant 5 : index
    %9 = memref.load %arg0[%c5] : memref<32xf32, #tpu.memory_space<smem>>
    %10 = vector.broadcast %9 : f32 to vector<36x36xf32>
    %11 = arith.mulf %8, %10 : vector<36x36xf32>
    %12 = arith.addf %7, %11 : vector<36x36xf32>
    %13 = vector.extract_strided_slice %0 {offsets = [2, 0], sizes = [36, 36], strides = [1, 1]} : vector<40x36xf32> to vector<36x36xf32>
    %c10 = arith.constant 10 : index
    %14 = memref.load %arg0[%c10] : memref<32xf32, #tpu.memory_space<smem>>
    %15 = vector.broadcast %14 : f32 to vector<36x36xf32>
    %16 = arith.mulf %13, %15 : vector<36x36xf32>
    %17 = arith.addf %12, %16 : vector<36x36xf32>
    %18 = vector.extract_strided_slice %0 {offsets = [3, 0], sizes = [36, 36], strides = [1, 1]} : vector<40x36xf32> to vector<36x36xf32>
    %c15 = arith.constant 15 : index
    %19 = memref.load %arg0[%c15] : memref<32xf32, #tpu.memory_space<smem>>
    %20 = vector.broadcast %19 : f32 to vector<36x36xf32>
    %21 = arith.mulf %18, %20 : vector<36x36xf32>
    %22 = arith.addf %17, %21 : vector<36x36xf32>
    %23 = vector.extract_strided_slice %0 {offsets = [4, 0], sizes = [36, 36], strides = [1, 1]} : vector<40x36xf32> to vector<36x36xf32>
    %c20 = arith.constant 20 : index
    %24 = memref.load %arg0[%c20] : memref<32xf32, #tpu.memory_space<smem>>
    %25 = vector.broadcast %24 : f32 to vector<36x36xf32>
    %26 = arith.mulf %23, %25 : vector<36x36xf32>
    %27 = arith.addf %22, %26 : vector<36x36xf32>
    %c0_2 = arith.constant 0 : index
    %c1 = arith.constant 1 : index
    %28 = vector.load %arg1[%c0_2, %c1] : memref<40x40xf32, #tpu.memory_space<vmem>>, vector<40x36xf32>
    %29 = vector.extract_strided_slice %28 {offsets = [0, 0], sizes = [36, 36], strides = [1, 1]} : vector<40x36xf32> to vector<36x36xf32>
    %c1_3 = arith.constant 1 : index
    %30 = memref.load %arg0[%c1_3] : memref<32xf32, #tpu.memory_space<smem>>
    %31 = vector.broadcast %30 : f32 to vector<36x36xf32>
    %32 = arith.mulf %29, %31 : vector<36x36xf32>
    %33 = vector.extract_strided_slice %28 {offsets = [1, 0], sizes = [36, 36], strides = [1, 1]} : vector<40x36xf32> to vector<36x36xf32>
    %c6 = arith.constant 6 : index
    %34 = memref.load %arg0[%c6] : memref<32xf32, #tpu.memory_space<smem>>
    %35 = vector.broadcast %34 : f32 to vector<36x36xf32>
    %36 = arith.mulf %33, %35 : vector<36x36xf32>
    %37 = arith.addf %32, %36 : vector<36x36xf32>
    %38 = vector.extract_strided_slice %28 {offsets = [2, 0], sizes = [36, 36], strides = [1, 1]} : vector<40x36xf32> to vector<36x36xf32>
    %c11 = arith.constant 11 : index
    %39 = memref.load %arg0[%c11] : memref<32xf32, #tpu.memory_space<smem>>
    %40 = vector.broadcast %39 : f32 to vector<36x36xf32>
    %41 = arith.mulf %38, %40 : vector<36x36xf32>
    %42 = arith.addf %37, %41 : vector<36x36xf32>
    %43 = vector.extract_strided_slice %28 {offsets = [3, 0], sizes = [36, 36], strides = [1, 1]} : vector<40x36xf32> to vector<36x36xf32>
    %c16 = arith.constant 16 : index
    %44 = memref.load %arg0[%c16] : memref<32xf32, #tpu.memory_space<smem>>
    %45 = vector.broadcast %44 : f32 to vector<36x36xf32>
    %46 = arith.mulf %43, %45 : vector<36x36xf32>
    %47 = arith.addf %42, %46 : vector<36x36xf32>
    %48 = vector.extract_strided_slice %28 {offsets = [4, 0], sizes = [36, 36], strides = [1, 1]} : vector<40x36xf32> to vector<36x36xf32>
    %c21 = arith.constant 21 : index
    %49 = memref.load %arg0[%c21] : memref<32xf32, #tpu.memory_space<smem>>
    %50 = vector.broadcast %49 : f32 to vector<36x36xf32>
    %51 = arith.mulf %48, %50 : vector<36x36xf32>
    %52 = arith.addf %47, %51 : vector<36x36xf32>
    %c0_4 = arith.constant 0 : index
    %c2 = arith.constant 2 : index
    %53 = vector.load %arg1[%c0_4, %c2] : memref<40x40xf32, #tpu.memory_space<vmem>>, vector<40x36xf32>
    %54 = vector.extract_strided_slice %53 {offsets = [0, 0], sizes = [36, 36], strides = [1, 1]} : vector<40x36xf32> to vector<36x36xf32>
    %c2_5 = arith.constant 2 : index
    %55 = memref.load %arg0[%c2_5] : memref<32xf32, #tpu.memory_space<smem>>
    %56 = vector.broadcast %55 : f32 to vector<36x36xf32>
    %57 = arith.mulf %54, %56 : vector<36x36xf32>
    %58 = vector.extract_strided_slice %53 {offsets = [1, 0], sizes = [36, 36], strides = [1, 1]} : vector<40x36xf32> to vector<36x36xf32>
    %c7 = arith.constant 7 : index
    %59 = memref.load %arg0[%c7] : memref<32xf32, #tpu.memory_space<smem>>
    %60 = vector.broadcast %59 : f32 to vector<36x36xf32>
    %61 = arith.mulf %58, %60 : vector<36x36xf32>
    %62 = arith.addf %57, %61 : vector<36x36xf32>
    %63 = vector.extract_strided_slice %53 {offsets = [2, 0], sizes = [36, 36], strides = [1, 1]} : vector<40x36xf32> to vector<36x36xf32>
    %c12 = arith.constant 12 : index
    %64 = memref.load %arg0[%c12] : memref<32xf32, #tpu.memory_space<smem>>
    %65 = vector.broadcast %64 : f32 to vector<36x36xf32>
    %66 = arith.mulf %63, %65 : vector<36x36xf32>
    %67 = arith.addf %62, %66 : vector<36x36xf32>
    %68 = vector.extract_strided_slice %53 {offsets = [3, 0], sizes = [36, 36], strides = [1, 1]} : vector<40x36xf32> to vector<36x36xf32>
    %c17 = arith.constant 17 : index
    %69 = memref.load %arg0[%c17] : memref<32xf32, #tpu.memory_space<smem>>
    %70 = vector.broadcast %69 : f32 to vector<36x36xf32>
    %71 = arith.mulf %68, %70 : vector<36x36xf32>
    %72 = arith.addf %67, %71 : vector<36x36xf32>
    %73 = vector.extract_strided_slice %53 {offsets = [4, 0], sizes = [36, 36], strides = [1, 1]} : vector<40x36xf32> to vector<36x36xf32>
    %c22 = arith.constant 22 : index
    %74 = memref.load %arg0[%c22] : memref<32xf32, #tpu.memory_space<smem>>
    %75 = vector.broadcast %74 : f32 to vector<36x36xf32>
    %76 = arith.mulf %73, %75 : vector<36x36xf32>
    %77 = arith.addf %72, %76 : vector<36x36xf32>
    %c0_6 = arith.constant 0 : index
    %c3 = arith.constant 3 : index
    %78 = vector.load %arg1[%c0_6, %c3] : memref<40x40xf32, #tpu.memory_space<vmem>>, vector<40x36xf32>
    %79 = vector.extract_strided_slice %78 {offsets = [0, 0], sizes = [36, 36], strides = [1, 1]} : vector<40x36xf32> to vector<36x36xf32>
    %c3_7 = arith.constant 3 : index
    %80 = memref.load %arg0[%c3_7] : memref<32xf32, #tpu.memory_space<smem>>
    %81 = vector.broadcast %80 : f32 to vector<36x36xf32>
    %82 = arith.mulf %79, %81 : vector<36x36xf32>
    %83 = vector.extract_strided_slice %78 {offsets = [1, 0], sizes = [36, 36], strides = [1, 1]} : vector<40x36xf32> to vector<36x36xf32>
    %c8 = arith.constant 8 : index
    %84 = memref.load %arg0[%c8] : memref<32xf32, #tpu.memory_space<smem>>
    %85 = vector.broadcast %84 : f32 to vector<36x36xf32>
    %86 = arith.mulf %83, %85 : vector<36x36xf32>
    %87 = arith.addf %82, %86 : vector<36x36xf32>
    %88 = vector.extract_strided_slice %78 {offsets = [2, 0], sizes = [36, 36], strides = [1, 1]} : vector<40x36xf32> to vector<36x36xf32>
    %c13 = arith.constant 13 : index
    %89 = memref.load %arg0[%c13] : memref<32xf32, #tpu.memory_space<smem>>
    %90 = vector.broadcast %89 : f32 to vector<36x36xf32>
    %91 = arith.mulf %88, %90 : vector<36x36xf32>
    %92 = arith.addf %87, %91 : vector<36x36xf32>
    %93 = vector.extract_strided_slice %78 {offsets = [3, 0], sizes = [36, 36], strides = [1, 1]} : vector<40x36xf32> to vector<36x36xf32>
    %c18 = arith.constant 18 : index
    %94 = memref.load %arg0[%c18] : memref<32xf32, #tpu.memory_space<smem>>
    %95 = vector.broadcast %94 : f32 to vector<36x36xf32>
    %96 = arith.mulf %93, %95 : vector<36x36xf32>
    %97 = arith.addf %92, %96 : vector<36x36xf32>
    %98 = vector.extract_strided_slice %78 {offsets = [4, 0], sizes = [36, 36], strides = [1, 1]} : vector<40x36xf32> to vector<36x36xf32>
    %c23 = arith.constant 23 : index
    %99 = memref.load %arg0[%c23] : memref<32xf32, #tpu.memory_space<smem>>
    %100 = vector.broadcast %99 : f32 to vector<36x36xf32>
    %101 = arith.mulf %98, %100 : vector<36x36xf32>
    %102 = arith.addf %97, %101 : vector<36x36xf32>
    %c0_8 = arith.constant 0 : index
    %c4 = arith.constant 4 : index
    %103 = vector.load %arg1[%c0_8, %c4] : memref<40x40xf32, #tpu.memory_space<vmem>>, vector<40x36xf32>
    %104 = vector.extract_strided_slice %103 {offsets = [0, 0], sizes = [36, 36], strides = [1, 1]} : vector<40x36xf32> to vector<36x36xf32>
    %c4_9 = arith.constant 4 : index
    %105 = memref.load %arg0[%c4_9] : memref<32xf32, #tpu.memory_space<smem>>
    %106 = vector.broadcast %105 : f32 to vector<36x36xf32>
    %107 = arith.mulf %104, %106 : vector<36x36xf32>
    %108 = vector.extract_strided_slice %103 {offsets = [1, 0], sizes = [36, 36], strides = [1, 1]} : vector<40x36xf32> to vector<36x36xf32>
    %c9 = arith.constant 9 : index
    %109 = memref.load %arg0[%c9] : memref<32xf32, #tpu.memory_space<smem>>
    %110 = vector.broadcast %109 : f32 to vector<36x36xf32>
    %111 = arith.mulf %108, %110 : vector<36x36xf32>
    %112 = arith.addf %107, %111 : vector<36x36xf32>
    %113 = vector.extract_strided_slice %103 {offsets = [2, 0], sizes = [36, 36], strides = [1, 1]} : vector<40x36xf32> to vector<36x36xf32>
    %c14 = arith.constant 14 : index
    %114 = memref.load %arg0[%c14] : memref<32xf32, #tpu.memory_space<smem>>
    %115 = vector.broadcast %114 : f32 to vector<36x36xf32>
    %116 = arith.mulf %113, %115 : vector<36x36xf32>
    %117 = arith.addf %112, %116 : vector<36x36xf32>
    %118 = vector.extract_strided_slice %103 {offsets = [3, 0], sizes = [36, 36], strides = [1, 1]} : vector<40x36xf32> to vector<36x36xf32>
    %c19 = arith.constant 19 : index
    %119 = memref.load %arg0[%c19] : memref<32xf32, #tpu.memory_space<smem>>
    %120 = vector.broadcast %119 : f32 to vector<36x36xf32>
    %121 = arith.mulf %118, %120 : vector<36x36xf32>
    %122 = arith.addf %117, %121 : vector<36x36xf32>
    %123 = vector.extract_strided_slice %103 {offsets = [4, 0], sizes = [36, 36], strides = [1, 1]} : vector<40x36xf32> to vector<36x36xf32>
    %c24 = arith.constant 24 : index
    %124 = memref.load %arg0[%c24] : memref<32xf32, #tpu.memory_space<smem>>
    %125 = vector.broadcast %124 : f32 to vector<36x36xf32>
    %126 = arith.mulf %123, %125 : vector<36x36xf32>
    %127 = arith.addf %122, %126 : vector<36x36xf32>
    %128 = arith.addf %27, %52 : vector<36x36xf32>
    %129 = arith.addf %77, %102 : vector<36x36xf32>
    %130 = arith.addf %128, %129 : vector<36x36xf32>
    %131 = arith.addf %130, %127 : vector<36x36xf32>
    %cst = arith.constant 0.000000e+00 : f32
    %132 = vector.broadcast %cst : f32 to vector<36x36xf32>
    %133 = arith.maximumf %131, %132 : vector<36x36xf32>
    %134 = vector.shape_cast %133 : vector<36x36xf32> to vector<1x36x36xf32>
    %cst_10 = arith.constant dense<0.000000e+00> : vector<1xf32>
    %135 = vector.multi_reduction <add>, %134, %cst_10 [1, 2] : vector<1x36x36xf32> to vector<1xf32>
    %136 = vector.shape_cast %135 : vector<1xf32> to vector<1x1x1xf32>
    %137 = vector.extract %136[0, 0, 0] : f32 from vector<1x1x1xf32>
    %cst_11 = arith.constant 7.71604944E-4 : f32
    %138 = arith.mulf %137, %cst_11 : f32
    %139 = vector.broadcast %138 : f32 to vector<36x36xf32>
    %140 = arith.subf %133, %139 : vector<36x36xf32>
    %141 = arith.mulf %140, %140 : vector<36x36xf32>
    %142 = vector.shape_cast %141 : vector<36x36xf32> to vector<1x36x36xf32>
    %cst_12 = arith.constant dense<0.000000e+00> : vector<1xf32>
    %143 = vector.multi_reduction <add>, %142, %cst_12 [1, 2] : vector<1x36x36xf32> to vector<1xf32>
    %144 = vector.shape_cast %143 : vector<1xf32> to vector<1x1x1xf32>
    %145 = vector.extract %144[0, 0, 0] : f32 from vector<1x1x1xf32>
    %cst_13 = arith.constant 7.71604944E-4 : f32
    %146 = arith.mulf %145, %cst_13 : f32
    %cst_14 = arith.constant 9.99999974E-6 : f32
    %147 = arith.addf %146, %cst_14 : f32
    %148 = math.rsqrt %147 : f32
    %c0_15 = arith.constant 0 : index
    %c0_16 = arith.constant 0 : index
    %c0_17 = arith.constant 0 : index
    %149 = vector.load %arg2[%c0_15, %c0_16, %c0_17] : memref<2x36x36xf32, #tpu.memory_space<vmem>>, vector<1x36x36xf32>
    %150 = vector.shape_cast %149 : vector<1x36x36xf32> to vector<36x36xf32>
    %151 = arith.mulf %133, %150 : vector<36x36xf32>
    %152 = vector.shape_cast %151 : vector<36x36xf32> to vector<1x36x36xf32>
    %cst_18 = arith.constant dense<0.000000e+00> : vector<1xf32>
    %153 = vector.multi_reduction <add>, %152, %cst_18 [1, 2] : vector<1x36x36xf32> to vector<1xf32>
    %154 = vector.shape_cast %153 : vector<1xf32> to vector<1x1x1xf32>
    %155 = vector.extract %154[0, 0, 0] : f32 from vector<1x1x1xf32>
    %c1_19 = arith.constant 1 : index
    %c0_20 = arith.constant 0 : index
    %c0_21 = arith.constant 0 : index
    %156 = vector.load %arg2[%c1_19, %c0_20, %c0_21] : memref<2x36x36xf32, #tpu.memory_space<vmem>>, vector<1x36x36xf32>
    %157 = vector.shape_cast %156 : vector<1x36x36xf32> to vector<36x36xf32>
    %158 = arith.mulf %133, %157 : vector<36x36xf32>
    %159 = vector.shape_cast %158 : vector<36x36xf32> to vector<1x36x36xf32>
    %cst_22 = arith.constant dense<0.000000e+00> : vector<1xf32>
    %160 = vector.multi_reduction <add>, %159, %cst_22 [1, 2] : vector<1x36x36xf32> to vector<1xf32>
    %161 = vector.shape_cast %160 : vector<1xf32> to vector<1x1x1xf32>
    %162 = vector.extract %161[0, 0, 0] : f32 from vector<1x1x1xf32>
    %163 = arith.mulf %148, %155 : f32
    %c26 = arith.constant 26 : index
    %164 = memref.load %arg0[%c26] : memref<32xf32, #tpu.memory_space<smem>>
    %165 = arith.addf %163, %164 : f32
    %c0_23 = arith.constant 0 : index
    %c0_24 = arith.constant 0 : index
    %166 = memref.load %arg3[%c0_23, %c0_24] : memref<1x2xf32, #tpu.memory_space<smem>>
    memref.store %165, %arg3[%c0_23, %c0_24] : memref<1x2xf32, #tpu.memory_space<smem>>
    %167 = arith.mulf %148, %162 : f32
    %c27 = arith.constant 27 : index
    %168 = memref.load %arg0[%c27] : memref<32xf32, #tpu.memory_space<smem>>
    %169 = arith.addf %167, %168 : f32
    %c0_25 = arith.constant 0 : index
    %c1_26 = arith.constant 1 : index
    %170 = memref.load %arg3[%c0_25, %c1_26] : memref<1x2xf32, #tpu.memory_space<smem>>
    memref.store %169, %arg3[%c0_25, %c1_26] : memref<1x2xf32, #tpu.memory_space<smem>>
    return
  }
}

</mosaic_0001>

<bundles_post_ra>
// kernel: tpu_custom_call.1
= control target key start
LH: loop header
LB: loop body
LE: loop exit
PB: predicated region body
PF: predicated region fallthrough
CT: control target
= control target key end

     0   :  { %8 = vsyncpa [#allocation4], 0  ;;  %s1675_s0 = inlined_call_operand.vmem [shape: f32[32], index: 0, kind: input, shape index: {}]   ;;  %s1676_s1 = inlined_call_operand.vmem [shape: f32[40,40], index: 1, kind: input, shape index: {}]   ;;  %s1677_s2 = inlined_call_operand.vmem [shape: f32[2,36,36], index: 2, kind: input, shape index: {}]   ;;  %s1678_s3 = inlined_call_operand.hbm [shape: f32[1,2], index: 3, kind: output, shape index: {}]  }
   0x1   :  { %9 = vsyncpa [#allocation3], 0  ;;  %s15_s14 = sshll.u32 %s1675_s0, 4  ;;  %s1028_s15 = smov [#allocation2]   ;;  %s16_s14 = int_to_ptr.vmem [resolvable:$true] %s15_s14 }
   0x2   :  { %18 = dma.vmem_to_smem %s16_s14, 16, %s1028_s15, [#allocation4]  }
   0x3   :  { %1024 = dma.done.wait [#allocation4], 16  }
   0x4   :  { %1025 = vsyncadd [#allocation4], 4294967280 }
   0x5   :  { %27 = sfence }
   0x6   :  { %s966_s16 = sld [smem:[#allocation2 + $0x3]]  ;;  %v1059_v0 = vld [vmem:[%s1676_s1] sm:$0xff]  ;;  %v1064_v1 = vld [vmem:[%s1676_s1 + $0x8] sm:$0xff]  ;;  %vm59_vm0 = vcmask 1046528   ;;  %v1069_v2 = vld [vmem:[%s1676_s1 + $0x10] sm:$0xff]  ;;  %vm91_vm1 = vcmask 1045504  }
   0x7   :  { %s967_s17 = sld [smem:[#allocation2 + $0x8]]  ;;  %vm123_vm2 = vcmask 1044480   ;;  %vm155_vm3 = vcmask 1043456   ;;  %v1076_v4 = vld [vmem:[%s1676_s1 + $0x18] sm:$0xff]  ;;  %v1131_v57 = vld [vmem:[%s1676_s1 + $0x20] sm:$0xff]  ;;  %s1029_s8 = smov 127  }
   0x8   :  { %s968_s18 = sld [smem:[#allocation2 + $0xd]]  ;;  %s1030_s13 = smov 124   ;;  %vm804_vm4 = vcmask 293888   ;;  %vm812_vm5 = vcmask 289792  }
   0x9   :  { %s969_s19 = sld [smem:[#allocation2 + $0x12]]  ;;  %s940_s26 = sshll.u32 %s1678_s3, 4  ;;  %s941_s26 = int_to_ptr.hbm [resolvable:$true] %s940_s26 }
   0xa   :  { %s970_s20 = sld [smem:[#allocation2 + $0x17]]  ;;  %s1032_s5 = smov [#allocation5]  }
   0xb   :  { %s1117_s28 = sld [smem:[#allocation2 + $0x1]] }
   0xc   :  { %v1071_v3 = vstv %s966_s16  ;;  %s1121_s29 = sld [smem:[#allocation2 + $0x6]] }
   0xd   :  { %v439_v5 = vmul.f32 %v1071_v3, %v1059_v0  ;;  %v1080_v6 = vstv %s967_s17  ;;  %v441_v7 = vmul.f32 %v1071_v3, %v1069_v2  ;;  %v440_v8 = vmul.f32 %v1071_v3, %v1064_v1  ;;  %s1126_s30 = sld [smem:[#allocation2 + $0xb]] }
   0xe   :  { %v446_v9 = vmul.f32 %v1080_v6, %v1059_v0  ;;  %v447_v10 = vmul.f32 %v1080_v6, %v1064_v1  ;;  %v1090_v11 = vstv %s968_s18  ;;  %v448_v12 = vmul.f32 %v1080_v6, %v1069_v2  ;;  %s1133_s6 = sld [smem:[#allocation2 + $0x10]] }
   0xf   :  { %v477_v13 = vmul.f32 %v1090_v11, %v1059_v0  ;;  %v478_v14 = vmul.f32 %v1090_v11, %v1064_v1  ;;  %v507_v15 = vstv %s969_s19  ;;  %v1100_v16 = vmul.f32 %v1080_v6, %v1076_v4  ;;  %s1138_s7 = sld [smem:[#allocation2 + $0x15]]  ;;  %s1031_s19 = smov 126  }
  0x10   :  { %v456_v17 = vrot.slane %v446_v9, 1  ;;  %v457_v18 = vrot.slane %v447_v10, 1  ;;  %v508_v19 = vmul.f32 %v507_v15, %v1059_v0  ;;  %v509_v20 = vmul.f32 %v507_v15, %v1064_v1  ;;  %s1197_s1 = sld [smem:[#allocation2 + $0x4]] }
  0x11   :  { %v487_v21 = vrot.slane %v477_v13, 2  ;;  %v488_v22 = vrot.slane %v478_v14, 2  ;;  %v538_v23 = vstv %s970_s20  ;;  %v459_v24 = vrot.slane %v448_v12, 1  ;;  %s1201_s9 = sld [smem:[#allocation2 + $0x9]] }
  0x12   :  { %v458_v25 = vsel %vm59_vm0, %v456_v17, %v457_v18  ;;  %v518_v26 = vrot.slane %v508_v19, 3  ;;  %v519_v27 = vrot.slane %v509_v20, 3  ;;  %v539_v28 = vmul.f32 %v538_v23, %v1059_v0  ;;  %s1229_s10 = sld [smem:[#allocation2 + $0xe]] }
  0x13   :  { %v470_v29 = vadd.f32 %v458_v25, %v439_v5  ;;  %v489_v30 = vsel %vm91_vm1, %v487_v21, %v488_v22  ;;  %v540_v31 = vmul.f32 %v538_v23, %v1064_v1  ;;  %v461_v32 = vrot.slane %v1100_v16, 1  ;;  %s1237_s11 = sld [smem:[#allocation2 + $0x13]] }
  0x14   :  { %v520_v33 = vsel %vm123_vm2, %v518_v26, %v519_v27  ;;  %v549_v34 = vrot.slane %v539_v28, 4  ;;  %v479_v35 = vmul.f32 %v1090_v11, %v1069_v2  ;;  %v480_v36 = vmul.f32 %v1090_v11, %v1076_v4  ;;  %s1250_s12 = sld [smem:[#allocation2 + $0x18]] }
  0x15   :  { %v501_v37 = vadd.f32 %v489_v30, %v470_v29  ;;  %v550_v38 = vrot.slane %v540_v31, 4  ;;  %v462_v39 = vsel %vm59_vm0, %v459_v24, %v461_v32  ;;  %v510_v40 = vmul.f32 %v507_v15, %v1069_v2  ;;  %s962_s14 = sld [smem:[#allocation2 + $0x7]] }
  0x16   :  { %v472_v41 = vadd.f32 %v462_v39, %v441_v7  ;;  %v490_v42 = vrot.slane %v479_v35, 2  ;;  %v492_v43 = vrot.slane %v480_v36, 2  ;;  %v511_v44 = vmul.f32 %v507_v15, %v1076_v4  ;;  %s963_s15 = sld [smem:[#allocation2 + $0xc]] }
  0x17   :  { %v532_v45 = vadd.f32 %v520_v33, %v501_v37  ;;  %v551_v46 = vsel %vm155_vm3, %v549_v34, %v550_v38  ;;  %v521_v47 = vrot.slane %v510_v40, 3  ;;  %v541_v48 = vmul.f32 %v538_v23, %v1069_v2  ;;  %s964_s16 = sld [smem:[#allocation2 + $0x11]] }
  0x18   :  { %v493_v49 = vsel %vm91_vm1, %v490_v42, %v492_v43  ;;  %v523_v50 = vrot.slane %v511_v44, 3  ;;  %v542_v51 = vmul.f32 %v538_v23, %v1076_v4  ;;  %v460_v52 = vsel %vm59_vm0, %v457_v18, %v459_v24  ;;  %s965_s17 = sld [smem:[#allocation2 + $0x16]] }
  0x19   :  { %v563_v53 = vadd.f32 %v551_v46, %v532_v45  ;;  %v503_v54 = vadd.f32 %v493_v49, %v472_v41  ;;  %v552_v55 = vrot.slane %v541_v48, 4  ;;  %v471_v56 = vadd.f32 %v460_v52, %v440_v8  ;;  %s961_s18 = sld [smem:[#allocation2 + $0x2]] }
  0x1a   :  { %v524_v58 = vsel %vm123_vm2, %v521_v47, %v523_v50  ;;  %v554_v59 = vrot.slane %v542_v51, 4  ;;  %v491_v60 = vsel %vm91_vm1, %v488_v22, %v490_v42  ;;  %v522_v61 = vsel %vm123_vm2, %v519_v27, %v521_v47  ;;  %s952_s20 = sld [smem:[#allocation2 + $0x5]] }
  0x1b   :  { %729 = vrot.lane.b32.xlu0 %v563_v53, %s1029_s8  ;;  %v534_v62 = vadd.f32 %v524_v58, %v503_v54  ;;  %v502_v63 = vadd.f32 %v491_v60, %v471_v56  ;;  %v553_v5 = vsel %vm155_vm3, %v550_v38, %v552_v55  ;;  %v442_v7 = vmul.f32 %v1071_v3, %v1076_v4  ;;  %s35_s21 = sld [smem:[#allocation2]] }
  0x1c   :  { %v555_v8 = vsel %vm155_vm3, %v552_v55, %v554_v59  ;;  %v450_v9 = vmul.f32 %v1080_v6, %v1131_v57  ;;  %v481_v10 = vmul.f32 %v1090_v11, %v1131_v57  ;;  %v512_v12 = vmul.f32 %v507_v15, %v1131_v57  ;;  %s953_s22 = sld [smem:[#allocation2 + $0xa]] }
  0x1d   :  { %v565_v13 = vadd.f32 %v555_v8, %v534_v62  ;;  %v533_v14 = vadd.f32 %v522_v61, %v502_v63  ;;  %v543_v16 = vmul.f32 %v538_v23, %v1131_v57  ;;  %v443_v17 = vmul.f32 %v1071_v3, %v1131_v57  ;;  %s954_s23 = sld [smem:[#allocation2 + $0xf]] }
  0x1e   :  { %v463_v18 = vrot.slane %v450_v9, 1  ;;  %v494_v19 = vrot.slane %v481_v10, 2  ;;  %v525_v20 = vrot.slane %v512_v12, 3  ;;  %v1154_v21 = vstv %s1117_s28  ;;  %s951_s24 = sld [smem:[#allocation2 + $0x19]] }
  0x1f   :  { %733 = vrot.lane.b32.xlu1 %v565_v13, %s1029_s8  ;;  %v564_v6 = vadd.f32 %v553_v5, %v533_v14  ;;  %v556_v11 = vrot.slane %v543_v16, 4  ;;  %v179_v15 = vmul.f32 %v1154_v21, %v1069_v2  ;;  %v1160_v22 = vstv %s1121_s29  ;;  %s955_s0 = sld [smem:[#allocation2 + $0x14]] }
  0x20   :  { %v464_v23 = vsel %vm59_vm0, %v461_v32, %v463_v18  ;;  %v495_v3 = vsel %vm91_vm1, %v492_v43, %v494_v19  ;;  %v526_v24 = vsel %vm123_vm2, %v523_v50, %v525_v20  ;;  %v474_v25 = vadd.f32 %v463_v18, %v443_v17 }
  0x21   :  { %v473_v26 = vadd.f32 %v464_v23, %v442_v7  ;;  %v557_v27 = vsel %vm155_vm3, %v554_v59, %v556_v11  ;;  %v1168_v28 = vmul.f32 %v1160_v22, %v1069_v2  ;;  %v187_v29 = vmul.f32 %v1160_v22, %v1076_v4 }
  0x22   :  { %v505_v30 = vadd.f32 %v494_v19, %v474_v25  ;;  %v1173_v31 = vstv %s1126_s30  ;;  %v1176_v33 = vstv %s1133_s6  ;;  %v1179_v32 = vstv %s1138_s7 }
  0x23   :  { %731 = vrot.lane.b32.xlu0 %v564_v6, %s1029_s8  ;;  %v504_v34 = vadd.f32 %v495_v3, %v473_v26  ;;  %v197_v35 = vrot.slane %v1168_v28, 1  ;;  %v199_v36 = vrot.slane %v187_v29, 1  ;;  %v217_v37 = vmul.f32 %v1173_v31, %v1069_v2 }
  0x24   :  { %v536_v38 = vadd.f32 %v525_v20, %v505_v30  ;;  %v218_v39 = vmul.f32 %v1173_v31, %v1076_v4  ;;  %v1189_v40 = vmul.f32 %v1176_v33, %v1069_v2  ;;  %v249_v41 = vmul.f32 %v1176_v33, %v1076_v4 }
  0x25   :  { %v535_v42 = vadd.f32 %v526_v24, %v504_v34  ;;  %v200_v43 = vsel %vm59_vm0, %v197_v35, %v199_v36  ;;  %v228_v44 = vrot.slane %v217_v37, 2  ;;  %v279_v45 = vmul.f32 %v1179_v32, %v1069_v2 }
  0x26   :  { %v567_v46 = vadd.f32 %v556_v11, %v536_v38  ;;  %v210_v47 = vadd.f32 %v200_v43, %v179_v15  ;;  %v230_v48 = vrot.slane %v218_v39, 2  ;;  %v259_v49 = vrot.slane %v1189_v40, 3 }
  0x27   :  { %v566_v50 = vadd.f32 %v557_v27, %v535_v42  ;;  %v261_v51 = vrot.slane %v249_v41, 3  ;;  %v280_v52 = vmul.f32 %v1179_v32, %v1076_v4  ;;  %v290_v53 = vrot.slane %v279_v45, 4 }
  0x28   :  { %737 = vrot.lane.b32.xlu2 %v567_v46, %s1029_s8  ;;  %v231_v54 = vsel %vm91_vm1, %v228_v44, %v230_v48  ;;  %v180_v55 = vmul.f32 %v1154_v21, %v1076_v4  ;;  %v1209_v56 = vmul.f32 %v1160_v22, %v1131_v57  ;;  %v1213_v58 = vmul.f32 %v1173_v31, %v1131_v57 }
  0x29   :  { %735 = vrot.lane.b32.xlu1 %v566_v50, %s1029_s8  ;;  %v241_v59 = vadd.f32 %v231_v54, %v210_v47  ;;  %v262_v60 = vsel %vm123_vm2, %v259_v49, %v261_v51  ;;  %v292_v61 = vrot.slane %v280_v52, 4  ;;  %v1219_v62 = vmul.f32 %v1176_v33, %v1131_v57 }
  0x2a   :  { %v201_v63 = vrot.slane %v1209_v56, 1  ;;  %v232_v5 = vrot.slane %v1213_v58, 2  ;;  %v1225_v7 = vmul.f32 %v1179_v32, %v1131_v57  ;;  %v178_v8 = vmul.f32 %v1154_v21, %v1064_v1 }
  0x2b   :  { %v272_v9 = vadd.f32 %v262_v60, %v241_v59  ;;  %v293_v10 = vsel %vm155_vm3, %v290_v53, %v292_v61  ;;  %v263_v12 = vrot.slane %v1219_v62, 3  ;;  %v1235_v13 = vmul.f32 %v1160_v22, %v1064_v1 }
  0x2c   :  { %v202_v14 = vsel %vm59_vm0, %v199_v36, %v201_v63  ;;  %v233_v16 = vsel %vm91_vm1, %v230_v48, %v232_v5  ;;  %v294_v17 = vrot.slane %v1225_v7, 4  ;;  %v1248_v18 = vmul.f32 %v1173_v31, %v1064_v1 }
  0x2d   :  { %v303_v19 = vadd.f32 %v293_v10, %v272_v9  ;;  %v211_v20 = vadd.f32 %v202_v14, %v180_v55  ;;  %v264_v6 = vsel %vm123_vm2, %v261_v51, %v263_v12  ;;  %v195_v11 = vrot.slane %v1235_v13, 1 }
  0x2e   :  { %v295_v15 = vsel %vm155_vm3, %v292_v61, %v294_v17  ;;  %v226_v23 = vrot.slane %v1248_v18, 2  ;;  %v1262_v3 = vmul.f32 %v1176_v33, %v1064_v1  ;;  %v1266_v24 = vmul.f32 %v1179_v32, %v1064_v1 }
  0x2f   :  { %v242_v25 = vadd.f32 %v233_v16, %v211_v20  ;;  %v198_v26 = vsel %vm59_vm0, %v195_v11, %v197_v35  ;;  %v1272_v27 = vstv %s1197_s1  ;;  %v1275_v28 = vstv %s1201_s9 }
  0x30   :  { %v209_v29 = vadd.f32 %v198_v26, %v178_v8  ;;  %v229_v30 = vsel %vm91_vm1, %v226_v23, %v228_v44  ;;  %v257_v34 = vrot.slane %v1262_v3, 3  ;;  %v288_v36 = vrot.slane %v1266_v24, 4 }
  0x31   :  { %708 = vrot.lane.b32.xlu1 %v303_v19, %s1029_s8  ;;  %v273_v37 = vadd.f32 %v264_v6, %v242_v25  ;;  %v571_v35 = vmul.f32 %v1272_v27, %v1064_v1  ;;  %v578_v38 = vmul.f32 %v1275_v28, %v1064_v1  ;;  %v1289_v39 = vmul.f32 %v1275_v28, %v1069_v2 }
  0x32   :  { %v240_v40 = vadd.f32 %v229_v30, %v209_v29  ;;  %v260_v41 = vsel %vm123_vm2, %v257_v34, %v259_v49  ;;  %v291_v42 = vsel %vm155_vm3, %v288_v36, %v290_v53  ;;  %v1298_v43 = vstv %s1229_s10 }
  0x33   :  { %v304_v44 = vadd.f32 %v295_v15, %v273_v37  ;;  %v588_v45 = vrot.slane %v578_v38, 1  ;;  %v590_v46 = vrot.slane %v1289_v39, 1  ;;  %v609_v47 = vmul.f32 %v1298_v43, %v1064_v1 }
  0x34   :  { %v271_v48 = vadd.f32 %v260_v41, %v240_v40  ;;  %v1305_v50 = vmul.f32 %v1298_v43, %v1069_v2  ;;  %v1308_v51 = vstv %s1237_s11  ;;  %v1311_v49 = vstv %s1250_s12 }
  0x35   :  { %v591_v52 = vsel %vm59_vm0, %v588_v45, %v590_v46  ;;  %v619_v53 = vrot.slane %v609_v47, 2  ;;  %v640_v54 = vmul.f32 %v1308_v51, %v1064_v1  ;;  %v1320_v55 = vmul.f32 %v1308_v51, %v1069_v2 }
  0x36   :  { %v302_v59 = vadd.f32 %v291_v42, %v271_v48  ;;  %v602_v60 = vadd.f32 %v591_v52, %v571_v35  ;;  %v621_v61 = vrot.slane %v1305_v50, 2  ;;  %v671_v8 = vmul.f32 %v1311_v49, %v1064_v1 }
  0x37   :  { %v650_v9 = vrot.slane %v640_v54, 3  ;;  %v652_v10 = vrot.slane %v1320_v55, 3  ;;  %v1328_v14 = vmul.f32 %v1311_v49, %v1069_v2  ;;  %v570_v16 = vmul.f32 %v1272_v27, %v1059_v0 }
  0x38   :  { %706 = vrot.lane.b32.xlu0 %v302_v59, %s1029_s8  ;;  %v622_v19 = vsel %vm91_vm1, %v619_v53, %v621_v61  ;;  %v681_v20 = vrot.slane %v671_v8, 4  ;;  %v577_v6 = vmul.f32 %v1275_v28, %v1059_v0  ;;  %v608_v15 = vmul.f32 %v1298_v43, %v1059_v0 }
  0x39   :  { %710 = vrot.lane.b32.xlu1 %v304_v44, %s1029_s8  ;;  %v633_v25 = vadd.f32 %v622_v19, %v602_v60  ;;  %v653_v26 = vsel %vm123_vm2, %v650_v9, %v652_v10  ;;  %v683_v29 = vrot.slane %v1328_v14, 4  ;;  %v639_v30 = vmul.f32 %v1308_v51, %v1059_v0 }
  0x3a   :  { %v587_v37 = vrot.slane %v577_v6, 1  ;;  %v618_v35 = vrot.slane %v608_v15, 2  ;;  %v670_v38 = vmul.f32 %v1311_v49, %v1059_v0  ;;  %v177_v40 = vmul.f32 %v1154_v21, %v1059_v0 }
  0x3b   :  { %v664_v41 = vadd.f32 %v653_v26, %v633_v25  ;;  %v684_v42 = vsel %vm155_vm3, %v681_v20, %v683_v29  ;;  %v649_v44 = vrot.slane %v639_v30, 3  ;;  %v184_v47 = vmul.f32 %v1160_v22, %v1059_v0 }
  0x3c   :  { %v589_v48 = vsel %vm59_vm0, %v587_v37, %v588_v45  ;;  %v620_v52 = vsel %vm91_vm1, %v618_v35, %v619_v53  ;;  %v680_v54 = vrot.slane %v670_v38, 4  ;;  %v215_v55 = vmul.f32 %v1173_v31, %v1059_v0 }
  0x3d   :  { %v695_v59 = vadd.f32 %v684_v42, %v664_v41  ;;  %v601_v60 = vadd.f32 %v589_v48, %v570_v16  ;;  %v651_v8 = vsel %vm123_vm2, %v649_v44, %v650_v9  ;;  %v194_v14 = vrot.slane %v184_v47, 1 }
  0x3e   :  { %v682_v19 = vsel %vm155_vm3, %v680_v54, %v681_v20  ;;  %v225_v6 = vrot.slane %v215_v55, 2  ;;  %v246_v15 = vmul.f32 %v1176_v33, %v1059_v0  ;;  %v277_v22 = vmul.f32 %v1179_v32, %v1059_v0 }
  0x3f   :  { %v632_v45 = vadd.f32 %v620_v52, %v601_v60  ;;  %v196_v53 = vsel %vm59_vm0, %v194_v14, %v195_v11  ;;  %v572_v31 = vmul.f32 %v1272_v27, %v1069_v2  ;;  %v1369_v9 = vmul.f32 %v1275_v28, %v1076_v4 }
  0x40   :  { %v208_v16 = vadd.f32 %v196_v53, %v177_v40  ;;  %v227_v33 = vsel %vm91_vm1, %v225_v6, %v226_v23  ;;  %v256_v20 = vrot.slane %v246_v15, 3  ;;  %v287_v25 = vrot.slane %v277_v22, 4 }
  0x41   :  { %781 = vrot.lane.b32.xlu1 %v695_v59, %s1030_s13  ;;  %v663_v32 = vadd.f32 %v651_v8, %v632_v45  ;;  %v592_v13 = vrot.slane %v1369_v9, 1  ;;  %v1378_v11 = vmul.f32 %v1298_v43, %v1076_v4  ;;  %v1382_v26 = vmul.f32 %v1308_v51, %v1076_v4 }
  0x42   :  { %v239_v30 = vadd.f32 %v227_v33, %v208_v16  ;;  %v258_v18 = vsel %vm123_vm2, %v256_v20, %v257_v34  ;;  %v289_v23 = vsel %vm155_vm3, %v287_v25, %v288_v36  ;;  %v1392_v37 = vmul.f32 %v1311_v49, %v1076_v4 }
  0x43   :  { %v694_v35 = vadd.f32 %v682_v19, %v663_v32  ;;  %v593_v38 = vsel %vm59_vm0, %v590_v46, %v592_v13  ;;  %v623_v40 = vrot.slane %v1378_v11, 2  ;;  %v654_v3 = vrot.slane %v1382_v26, 3 }
  0x44   :  { %v270_v34 = vadd.f32 %v258_v18, %v239_v30  ;;  %v603_v41 = vadd.f32 %v593_v38, %v572_v31  ;;  %v685_v24 = vrot.slane %v1392_v37, 4  ;;  %v181_v36 = vmul.f32 %v1154_v21, %v1131_v57 }
  0x45   :  { %779 = vrot.lane.b32.xlu0 %v694_v35, %s1030_s13  ;;  %v624_v39 = vsel %vm91_vm1, %v621_v61, %v623_v40  ;;  %v655_v46 = vsel %vm123_vm2, %v652_v10, %v654_v3  ;;  %v574_v10 = vmul.f32 %v1272_v27, %v1131_v57  ;;  %v643_v7 = vmul.f32 %v1308_v51, %v1131_v57 }
  0x46   :  { %v301_v42 = vadd.f32 %v289_v23, %v270_v34  ;;  %v634_v44 = vadd.f32 %v624_v39, %v603_v41  ;;  %v212_v47 = vadd.f32 %v201_v63, %v181_v36  ;;  %v686_v21 = vsel %vm155_vm3, %v683_v29, %v685_v24 }
  0x47   :  { %v581_v63 = vmul.f32 %v1275_v28, %v1131_v57  ;;  %v656_v29 = vrot.slane %v643_v7, 3  ;;  %v674_v28 = vmul.f32 %v1311_v49, %v1131_v57  ;;  %v314_v54 = vstv %s962_s14 }
  0x48   :  { %704 = vrot.lane.b32.xlu2 %v301_v42, %s1029_s8  ;;  %v665_v48 = vadd.f32 %v655_v46, %v634_v44  ;;  %v243_v50 = vadd.f32 %v232_v5, %v212_v47  ;;  %v612_v5 = vmul.f32 %v1298_v43, %v1131_v57  ;;  %v316_v43 = vmul.f32 %v314_v54, %v1064_v1 }
  0x49   :  { %v594_v58 = vrot.slane %v581_v63, 1  ;;  %v687_v59 = vrot.slane %v674_v28, 4  ;;  %v345_v8 = vstv %s963_s15  ;;  %v315_v14 = vmul.f32 %v314_v54, %v1059_v0 }
  0x4a   :  { %v696_v61 = vadd.f32 %v686_v21, %v665_v48  ;;  %v274_v52 = vadd.f32 %v263_v12, %v243_v50  ;;  %v625_v12 = vrot.slane %v612_v5, 2  ;;  %v347_v51 = vmul.f32 %v345_v8, %v1064_v1 }
  0x4b   :  { %v605_v62 = vadd.f32 %v594_v58, %v574_v10  ;;  %v1441_v19 = vstv %s964_s16  ;;  %v1443_v6 = vstv %s965_s17  ;;  %v346_v49 = vmul.f32 %v345_v8, %v1059_v0 }
  0x4c   :  { %783 = vrot.lane.b32.xlu1 %v696_v61, %s1030_s13  ;;  %v305_v56 = vadd.f32 %v294_v17, %v274_v52  ;;  %v307_v15 = vstv %s961_s18  ;;  %v326_v22 = vrot.slane %v316_v43, 1  ;;  %v325_v45 = vrot.slane %v315_v14, 1 }
  0x4d   :  { %v636_v17 = vadd.f32 %v625_v12, %v605_v62  ;;  %v318_v53 = vmul.f32 %v314_v54, %v1076_v4  ;;  %v317_v31 = vmul.f32 %v314_v54, %v1069_v2  ;;  %v1450_v16 = vmul.f32 %v1441_v19, %v1064_v1 }
  0x4e   :  { %v1454_v33 = vmul.f32 %v1443_v6, %v1064_v1  ;;  %v357_v20 = vrot.slane %v347_v51, 2  ;;  %v308_v25 = vmul.f32 %v307_v15, %v1059_v0  ;;  %v356_v32 = vrot.slane %v346_v49, 2 }
  0x4f   :  { %v667_v55 = vadd.f32 %v656_v29, %v636_v17  ;;  %v377_v30 = vmul.f32 %v1441_v19, %v1059_v0  ;;  %v327_v18 = vsel %vm59_vm0, %v325_v45, %v326_v22  ;;  %v349_v23 = vmul.f32 %v345_v8, %v1076_v4 }
  0x50   :  { %712 = vrot.lane.b32.xlu2 %v305_v56, %s1029_s8  ;;  %v330_v35 = vrot.slane %v318_v53, 1  ;;  %v328_v38 = vrot.slane %v317_v31, 1  ;;  %v388_v34 = vrot.slane %v1450_v16, 3  ;;  %v419_v41 = vrot.slane %v1454_v33, 4 }
  0x51   :  { %v698_v60 = vadd.f32 %v687_v59, %v667_v55  ;;  %v348_v36 = vmul.f32 %v345_v8, %v1069_v2  ;;  %v339_v39 = vadd.f32 %v327_v18, %v308_v25  ;;  %v358_v46 = vsel %vm91_vm1, %v356_v32, %v357_v20 }
  0x52   :  { %v387_v42 = vrot.slane %v377_v30, 3  ;;  %v573_v44 = vmul.f32 %v1272_v27, %v1076_v4  ;;  %v408_v47 = vmul.f32 %v1443_v6, %v1059_v0  ;;  %v361_v21 = vrot.slane %v349_v23, 2 }
  0x53   :  { %v380_v48 = vmul.f32 %v1441_v19, %v1076_v4  ;;  %v595_v50 = vsel %vm59_vm0, %v592_v13, %v594_v58  ;;  %v310_v61 = vmul.f32 %v307_v15, %v1069_v2  ;;  %v331_v52 = vsel %vm59_vm0, %v328_v38, %v330_v35 }
  0x54   :  { %787 = vrot.lane.b32.xlu1 %v698_v60, %s1030_s13  ;;  %v604_v56 = vadd.f32 %v595_v50, %v573_v44  ;;  %v626_v27 = vsel %vm91_vm1, %v623_v40, %v625_v12  ;;  %v359_v63 = vrot.slane %v348_v36, 2  ;;  %v379_v10 = vmul.f32 %v1441_v19, %v1069_v2 }
  0x55   :  { %v319_v5 = vmul.f32 %v314_v54, %v1131_v57  ;;  %v657_v9 = vsel %vm123_vm2, %v654_v3, %v656_v29  ;;  %v370_v13 = vadd.f32 %v358_v46, %v339_v39  ;;  %v389_v58 = vsel %vm123_vm2, %v387_v42, %v388_v34 }
  0x56   :  { %v309_v62 = vmul.f32 %v307_v15, %v1064_v1  ;;  %v635_v7 = vadd.f32 %v626_v27, %v604_v56  ;;  %v418_v17 = vrot.slane %v408_v47, 4  ;;  %v411_v11 = vmul.f32 %v1443_v6, %v1076_v4 }
  0x57   :  { %v329_v40 = vsel %vm59_vm0, %v326_v22, %v328_v38  ;;  %v688_v12 = vsel %vm155_vm3, %v685_v24, %v687_v59  ;;  %v392_v28 = vrot.slane %v380_v48, 3  ;;  %v341_v26 = vadd.f32 %v331_v52, %v310_v61 }
  0x58   :  { %v410_v3 = vmul.f32 %v1443_v6, %v1069_v2  ;;  %v666_v29 = vadd.f32 %v657_v9, %v635_v7  ;;  %v362_v54 = vsel %vm91_vm1, %v359_v63, %v361_v21  ;;  %v390_v55 = vrot.slane %v379_v10, 3 }
  0x59   :  { %v332_v60 = vrot.slane %v319_v5, 1  ;;  %v350_v43 = vmul.f32 %v345_v8, %v1131_v57  ;;  %v401_v14 = vadd.f32 %v389_v58, %v370_v13  ;;  %v340_v51 = vadd.f32 %v329_v40, %v309_v62 }
  0x5a   :  { %v697_v49 = vadd.f32 %v688_v12, %v666_v29  ;;  %v420_v22 = vsel %vm155_vm3, %v418_v17, %v419_v41  ;;  %v423_v37 = vrot.slane %v411_v11, 4  ;;  %v360_v24 = vsel %vm91_vm1, %v357_v20, %v359_v63 }
  0x5b   :  { %v372_v59 = vadd.f32 %v362_v54, %v341_v26  ;;  %v421_v45 = vrot.slane %v410_v3, 4  ;;  %v311_v53 = vmul.f32 %v307_v15, %v1076_v4  ;;  %v312_v31 = vmul.f32 %v307_v15, %v1131_v57 }
  0x5c   :  { %v393_v16 = vsel %vm123_vm2, %v390_v55, %v392_v28  ;;  %v333_v33 = vsel %vm59_vm0, %v330_v35, %v332_v60  ;;  %v363_v25 = vrot.slane %v350_v43, 2  ;;  %v381_v8 = vmul.f32 %v1441_v19, %v1131_v57 }
  0x5d   :  { %v432_v32 = vadd.f32 %v420_v22, %v401_v14  ;;  %v371_v30 = vadd.f32 %v360_v24, %v340_v51  ;;  %v391_v18 = vsel %vm123_vm2, %v388_v34, %v390_v55  ;;  %v403_v23 = vadd.f32 %v393_v16, %v372_v59 }
  0x5e   :  { %v342_v20 = vadd.f32 %v333_v33, %v311_v53  ;;  %v343_v38 = vadd.f32 %v332_v60, %v312_v31  ;;  %v424_v39 = vsel %vm155_vm3, %v421_v45, %v423_v37  ;;  %v364_v15 = vsel %vm91_vm1, %v361_v21, %v363_v25 }
  0x5f   :  { %v394_v46 = vrot.slane %v381_v8, 3  ;;  %v412_v35 = vmul.f32 %v1443_v6, %v1131_v57  ;;  %v402_v44 = vadd.f32 %v391_v18, %v371_v30  ;;  %v422_v19 = vsel %vm155_vm3, %v419_v41, %v421_v45 }
  0x60   :  { %v434_v47 = vadd.f32 %v424_v39, %v403_v23  ;;  %v373_v34 = vadd.f32 %v364_v15, %v342_v20  ;;  %v374_v48 = vadd.f32 %v363_v25, %v343_v38  ;;  %v48_v17 = vstv %s952_s20 }
  0x61   :  { %v395_v61 = vsel %vm123_vm2, %v392_v28, %v394_v46  ;;  %v425_v52 = vrot.slane %v412_v35, 4  ;;  %v433_v56 = vadd.f32 %v422_v19, %v402_v44  ;;  %v1514_v11 = vstv %s35_s21  ;;  %s981_s21 = sld [smem:[#allocation2 + $0x1a]] }
  0x62   :  { %v404_v21 = vadd.f32 %v395_v61, %v373_v34  ;;  %v405_v63 = vadd.f32 %v394_v46, %v374_v48  ;;  %v50_v40 = vmul.f32 %v48_v17, %v1064_v1  ;;  %v80_v12 = vstv %s953_s22  ;;  %s982_s22 = sld [smem:[#allocation2 + $0x1b]] }
  0x63   :  { %v426_v6 = vsel %vm155_vm3, %v423_v37, %v425_v52  ;;  %v49_v26 = vmul.f32 %v48_v17, %v1059_v0  ;;  %v82_v3 = vmul.f32 %v80_v12, %v1064_v1  ;;  %v1521_v29 = vstv %s954_s23 }
  0x64   :  { %v435_v41 = vadd.f32 %v426_v6, %v404_v21  ;;  %v436_v9 = vadd.f32 %v425_v52, %v405_v63  ;;  %v37_v54 = vmul.f32 %v1514_v11, %v1059_v0  ;;  %v81_v55 = vmul.f32 %v80_v12, %v1059_v0 }
  0x65   :  { %v1526_v60 = vstv %s951_s24  ;;  %v61_v43 = vrot.slane %v50_v40, 1  ;;  %v60_v14 = vrot.slane %v49_v26, 1  ;;  %v51_v22 = vmul.f32 %v48_v17, %v1069_v2 }
  0x66   :  { %v114_v37 = vmul.f32 %v1521_v29, %v1064_v1  ;;  %v1536_v24 = vstv %s955_s0  ;;  %v113_v59 = vmul.f32 %v1521_v29, %v1059_v0  ;;  %v93_v45 = vrot.slane %v82_v3, 2 }
  0x67   :  { %v42_v53 = vadd.f32 %v37_v54, %v1526_v60  ;;  %v92_v31 = vrot.slane %v81_v55, 2  ;;  %v38_v16 = vmul.f32 %v1514_v11, %v1064_v1  ;;  %v62_v33 = vsel %vm59_vm0, %v60_v14, %v61_v43 }
  0x68   :  { %v1545_v25 = vmul.f32 %v80_v12, %v1076_v4  ;;  %v39_v8 = vmul.f32 %v1514_v11, %v1069_v2  ;;  %v63_v30 = vrot.slane %v51_v22, 1  ;;  %v83_v18 = vmul.f32 %v80_v12, %v1069_v2 }
  0x69   :  { %v125_v23 = vrot.slane %v114_v37, 3  ;;  %v146_v20 = vmul.f32 %v1536_v24, %v1064_v1  ;;  %v124_v38 = vrot.slane %v113_v59, 3  ;;  %v74_v15 = vadd.f32 %v62_v33, %v42_v53 }
  0x6a   :  { %v94_v46 = vsel %vm91_vm1, %v92_v31, %v93_v45  ;;  %v1560_v35 = vmul.f32 %v1521_v29, %v1076_v4  ;;  %v97_v44 = vrot.slane %v1545_v25, 2  ;;  %v44_v19 = vadd.f32 %v39_v8, %v1526_v60 }
  0x6b   :  { %v115_v1 = vmul.f32 %v1521_v29, %v1069_v2  ;;  %v95_v34 = vrot.slane %v83_v18, 2  ;;  %v41_v48 = vmul.f32 %v1514_v11, %v1131_v57  ;;  %v157_v61 = vrot.slane %v146_v20, 4 }
  0x6c   :  { %v126_v52 = vsel %vm123_vm2, %v124_v38, %v125_v23  ;;  %v106_v63 = vadd.f32 %v94_v46, %v74_v15  ;;  %v148_v6 = vmul.f32 %v1536_v24, %v1076_v4  ;;  %v85_v40 = vmul.f32 %v80_v12, %v1131_v57 }
  0x6d   :  { %v40_v12 = vmul.f32 %v1514_v11, %v1076_v4  ;;  %v149_v20 = vmul.f32 %v1536_v24, %v1131_v57 }
  0x6e   :  { %v138_v26 = vadd.f32 %v126_v52, %v106_v63  ;;  %v161_v54 = vrot.slane %v148_v6, 4  ;;  %v99_v59 = vrot.slane %v85_v40, 2  ;;  %v976_v40 = vld [vmem:[%s1677_s2 + $0x28] sm:$0xff] }
  0x6f   :  { %v45_v38 = vadd.f32 %v40_v12, %v1526_v60  ;;  %v163_v46 = vrot.slane %v149_v20, 4 }
  0x82   :  { %v738_v13 = vpop.permute.xlu2 %737 }
  0x83   :  { %v748_v7 = vadd.f32 %v738_v13, %v436_v9  ;;  %v127_v9 = vrot.slane %v115_v1, 3  ;;  %v147_v13 = vmul.f32 %v1536_v24, %v1069_v2 }
  0x85   :  { %v128_v2 = vsel %vm123_vm2, %v125_v23, %v127_v9 }
  0x8d   :  { %v730_v36 = vpop.permute.xlu0 %729 }
  0x8e   :  { %v744_v42 = vadd.f32 %v730_v36, %v432_v32  ;;  %v145_v36 = vmul.f32 %v1536_v24, %v1059_v0  ;;  %v64_v0 = vsel %vm59_vm0, %v61_v43, %v63_v30 }
  0x90   :  { %754 = vrot.lane.b32.xlu2 %v744_v42, %s1031_s19  ;;  %v43_v42 = vadd.f32 %v38_v16, %v1526_v60 }
  0x91   :  { %v734_v50 = vpop.permute.xlu1 %733 }
  0x92   :  { %v746_v27 = vadd.f32 %v734_v50, %v434_v47  ;;  %v53_v50 = vmul.f32 %v48_v17, %v1131_v57 }
  0x95   :  { %v732_v10 = vpop.permute.xlu0 %731 }
  0x96   :  { %v745_v5 = vadd.f32 %v732_v10, %v433_v56  ;;  %v156_v56 = vrot.slane %v145_v36, 4  ;;  %v129_v10 = vrot.slane %v1560_v35, 3 }
  0x98   :  { %756 = vrot.lane.b32.xlu0 %v745_v5, %s1031_s19  ;;  %758 = vrot.lane.b32.xlu2 %v746_v27, %s1031_s19  ;;  %v75_v5 = vadd.f32 %v64_v0, %v43_v42  ;;  %v158_v3 = vsel %vm155_vm3, %v156_v56, %v157_v61  ;;  %v130_v14 = vsel %vm123_vm2, %v127_v9, %v129_v10 }
  0x99   :  { %v170_v31 = vadd.f32 %v158_v3, %v138_v26  ;;  %v100_v42 = vsel %vm91_vm1, %v97_v44, %v99_v59 }
  0x9b   :  { %v736_v58 = vpop.permute.xlu1 %735 }
  0x9c   :  { %v747_v62 = vadd.f32 %v736_v58, %v435_v41  ;;  %v96_v58 = vsel %vm91_vm1, %v93_v45, %v95_v34  ;;  %v117_v45 = vmul.f32 %v1521_v29, %v1131_v57 }
  0x9d   :  { %v107_v55 = vadd.f32 %v96_v58, %v75_v5  ;;  %v869_v5 = vld [vmem:[%s1677_s2 + $0x8] sm:$0xff] }
  0x9e   :  { %v131_v23 = vrot.slane %v117_v45, 3 }
  0x9f   :  { %v139_v53 = vadd.f32 %v128_v2, %v107_v55  ;;  %v870_v55 = vld [vmem:[%s1677_s2 + $0x10] sm:$0xff] }
  0xa0   :  { %760 = vrot.lane.b32.xlu0 %v747_v62, %s1031_s19  ;;  %762 = vrot.lane.b32.xlu2 %v748_v7, %s1031_s19  ;;  %v98_v62 = vsel %vm91_vm1, %v95_v34, %v97_v44  ;;  %v46_v7 = vadd.f32 %v41_v48, %v1526_v60  ;;  %v164_v44 = vsel %vm155_vm3, %v161_v54, %v163_v46 }
  0xa2   :  { %v1517_v28 = vpop.permute.xlu2 %704 }
  0xa3   :  { %v1528_v51 = vpop.permute.xlu1 %708  ;;  %v719_v11 = vadd.f32 %v1517_v28, %v170_v31  ;;  %v978_v31 = vld [vmem:[%s1677_s2 + $0x38] sm:$0xff] }
  0xa8   :  { %785 = vrot.lane.b32.xlu0 %v697_v49, %s1030_s13  ;;  %v1531_v49 = vmul.f32 %v48_v17, %v1076_v4  ;;  %v67_v17 = vrot.slane %v53_v50, 1 }
  0xaa   :  { %v65_v32 = vrot.slane %v1531_v49, 1  ;;  %v1555_v39 = vpop.permute.xlu2 %712  ;;  %v707_v21 = vpop.permute.xlu0 %706  ;;  %v159_v49 = vrot.slane %v147_v13, 4  ;;  %v78_v37 = vadd.f32 %v67_v17, %v46_v7  ;;  %v977_v7 = vld [vmem:[%s1677_s2 + $0x30] sm:$0xff] }
  0xab   :  { %v1573_v27 = vpop.permute.xlu1 %710 }
  0xac   :  { %v66_v47 = vsel %vm59_vm0, %v63_v30, %v65_v32  ;;  %v162_v33 = vsel %vm155_vm3, %v159_v49, %v161_v54  ;;  %v160_v25 = vsel %vm155_vm3, %v157_v61, %v159_v49  ;;  %v110_v18 = vadd.f32 %v99_v59, %v78_v37 }
  0xad   :  { %v76_v41 = vadd.f32 %v66_v47, %v44_v19  ;;  %v68_v29 = vsel %vm59_vm0, %v65_v32, %v67_v17  ;;  %v171_v36 = vadd.f32 %v160_v25, %v139_v53  ;;  %v132_v32 = vsel %vm123_vm2, %v129_v10, %v131_v23 }
  0xae   :  { %v142_v15 = vadd.f32 %v131_v23, %v110_v18  ;;  %v77_v35 = vadd.f32 %v68_v29, %v45_v38 }
  0xaf   :  { %v108_v43 = vadd.f32 %v98_v62, %v76_v41  ;;  %v720_v1 = vadd.f32 %v707_v21, %v171_v36 }
  0xb0   :  { %v174_v34 = vadd.f32 %v163_v46, %v142_v15  ;;  %v109_v57 = vadd.f32 %v100_v42, %v77_v35 }
  0xb1   :  { %v140_v16 = vadd.f32 %v130_v14, %v108_v43 }
  0xb2   :  { %v723_v28 = vadd.f32 %v1555_v39, %v174_v34  ;;  %v141_v52 = vadd.f32 %v132_v32, %v109_v57  ;;  %v868_v39 = vld [vmem:[%s1677_s2] sm:$0xff]  ;;  %v980_v57 = vld [vmem:[%s1677_s2 + $0x48] sm:$0xf] }
  0xb3   :  { %v782_v8 = vpop.permute.xlu1 %781  ;;  %v172_v4 = vadd.f32 %v162_v33, %v140_v16  ;;  %v871_v16 = vld [vmem:[%s1677_s2 + $0x18] sm:$0xff]  ;;  %v872_v33 = vld [vmem:[%s1677_s2 + $0x20] sm:$0xf] }
  0xb4   :  { %v173_v41 = vadd.f32 %v164_v44, %v141_v52 }
  0xb5   :  { %v721_v0 = vadd.f32 %v1528_v51, %v172_v4 }
  0xb6   :  { %v722_v17 = vadd.f32 %v1573_v27, %v173_v41 }
  0xb7   :  { %v780_v30 = vpop.permute.xlu0 %779 }
  0xbe   :  { %v784_v48 = vpop.permute.xlu1 %783 }
  0xc6   :  { %v788_v13 = vpop.permute.xlu1 %787 }
  0xea   :  { %v755_v22 = vpop.permute.xlu2 %754 }
  0xeb   :  { %v769_v24 = vadd.f32 %v755_v22, %v719_v11 }
  0xed   :  { %v794_v56 = vadd.f32 %v780_v30, %v769_v24 }
  0xef   :  { %v1608_v10 = vmax.f32 %v794_v56, 0.0 }
  0xf1   :  { %v873_v26 = vmul.f32 %v868_v39, %v1608_v10  ;;  %v805_v14 = vsel %vm804_vm4, %v1608_v10, 0.0  ;;  %v902_v2 = vmul.f32 %v976_v40, %v1608_v10 }
  0xf2   :  { %v759_v19 = vpop.permute.xlu2 %758 }
  0xf3   :  { %v771_v61 = vadd.f32 %v759_v19, %v721_v0  ;;  %v878_v53 = vsel %vm804_vm4, %v873_v26, 0.0  ;;  %v907_v36 = vsel %vm804_vm4, %v902_v2, 0.0 }
  0xf5   :  { %v796_v51 = vadd.f32 %v784_v48, %v771_v61 }
  0xf7   :  { %v1614_v62 = vmax.f32 %v796_v51, 0.0 }
  0xf9   :  { %v875_v59 = vmul.f32 %v870_v55, %v1614_v62  ;;  %v808_v18 = vsel %vm804_vm4, %v1614_v62, 0.0  ;;  %v904_v29 = vmul.f32 %v978_v31, %v1614_v62 }
  0xfa   :  { %v763_v63 = vpop.permute.xlu2 %762 }
  0xfb   :  { %v773_v9 = vadd.f32 %v763_v63, %v723_v28  ;;  %v881_v38 = vsel %vm804_vm4, %v875_v59, 0.0 }
  0xfd   :  { %v798_v3 = vadd.f32 %v788_v13, %v773_v9 }
  0xff   :  { %v803_v45 = vmax.f32 %v798_v3, 0.0 }
 0x101   :  { %v877_v15 = vmul.f32 %v872_v33, %v803_v45  ;;  %v906_v61 = vmul.f32 %v980_v57, %v803_v45 }
 0x103   :  { %v885_v24 = vsel %vm812_vm5, %v877_v15, 0.0  ;;  %v914_v52 = vsel %vm812_vm5, %v906_v61, 0.0 }
 0x10a   :  { %v757_v47 = vpop.permute.xlu0 %756 }
 0x10b   :  { %v770_v60 = vadd.f32 %v757_v47, %v720_v1  ;;  %v813_v1 = vsel %vm812_vm5, %v803_v45, 0.0 }
 0x10d   :  { %v795_v50 = vadd.f32 %v782_v8, %v770_v60  ;;  %v979_v8 = vld [vmem:[%s1677_s2 + $0x40] sm:$0xff]  ;;  %v910_v60 = vsel %vm804_vm4, %v904_v29, 0.0 }
 0x10f   :  { %v1603_v21 = vmax.f32 %v795_v50, 0.0 }
 0x111   :  { %v874_v58 = vmul.f32 %v869_v5, %v1603_v21  ;;  %v806_v54 = vsel %vm804_vm4, %v1603_v21, 0.0  ;;  %v903_v49 = vmul.f32 %v977_v7, %v1603_v21 }
 0x112   :  { %v761_v6 = vpop.permute.xlu0 %760  ;;  %v807_v37 = vadd.f32 %v806_v54, %v805_v14 }
 0x113   :  { %v772_v43 = vadd.f32 %v761_v6, %v722_v17  ;;  %v879_v27 = vsel %vm804_vm4, %v874_v58, 0.0  ;;  %v908_v23 = vsel %vm804_vm4, %v903_v49, 0.0 }
 0x114   :  { %v880_v25 = vadd.f32 %v879_v27, %v878_v53  ;;  %v809_v20 = vadd.f32 %v808_v18, %v807_v37  ;;  %v909_v19 = vadd.f32 %v908_v23, %v907_v36 }
 0x116   :  { %v882_v42 = vadd.f32 %v881_v38, %v880_v25  ;;  %v911_v50 = vadd.f32 %v910_v60, %v909_v19 }
 0x11a   :  { %v786_v22 = vpop.permute.xlu0 %785 }
 0x11b   :  { %v797_v12 = vadd.f32 %v786_v22, %v772_v43 }
 0x11d   :  { %v802_v30 = vmax.f32 %v797_v12, 0.0 }
 0x11f   :  { %v810_v4 = vsel %vm804_vm4, %v802_v30, 0.0  ;;  %v876_v11 = vmul.f32 %v871_v16, %v802_v30  ;;  %v905_v46 = vmul.f32 %v979_v8, %v802_v30 }
 0x120   :  { %v811_v35 = vadd.f32 %v810_v4, %v809_v20 }
 0x121   :  { %v883_v0 = vsel %vm804_vm4, %v876_v11, 0.0  ;;  %v912_v32 = vsel %vm804_vm4, %v905_v46, 0.0 }
 0x122   :  { %v814_v47 = vadd.f32 %v813_v1, %v811_v35  ;;  %v884_v34 = vadd.f32 %v883_v0, %v882_v42  ;;  %v913_v28 = vadd.f32 %v912_v32, %v911_v50 }
 0x124   :  { %815 = vadd.xlane.f32.xlu2 %v814_v47  ;;  %v886_v48 = vadd.f32 %v885_v24, %v884_v34  ;;  %v915_v56 = vadd.f32 %v914_v52, %v913_v28 }
 0x126   :  { %887 = vadd.xlane.f32.xlu1 %v886_v48 }
 0x12c   :  { %916 = vadd.xlane.f32.xlu2 %v915_v56 }
 0x197   :  { %v816_v44 = vpop.xlane.xlu2 %815 }
 0x198   :  { %v817_v63 = vrot.slane %v816_v44, 4 }
 0x199   :  { %v888_v25 = vpop.xlane.xlu1 %887 }
 0x19a   :  { %v818_v51 = vadd.f32 %v817_v63, %v816_v44 }
 0x19c   :  { %v819_v6 = vrot.slane %v818_v51, 2 }
 0x19e   :  { %v820_v5 = vadd.f32 %v819_v6, %v818_v51 }
 0x19f   :  { %v917_v8 = vpop.xlane.xlu2 %916 }
 0x1a0   :  { %v821_v41 = vrot.slane %v820_v5, 1  ;;  %v918_v18 = vrot.slane %v917_v8, 4 }
 0x1a2   :  { %v822_v9 = vadd.f32 %v821_v41, %v820_v5  ;;  %v919_v38 = vadd.f32 %v918_v18, %v917_v8 }
 0x1a4   :  { %983 = vpush %v822_v9  ;;  %v920_v4 = vrot.slane %v919_v38, 2 }
 0x1a6   :  { %v921_v35 = vadd.f32 %v920_v4, %v919_v38 }
 0x1a8   :  { %v922_v0 = vrot.slane %v921_v35, 1 }
 0x1aa   :  { %v923_v24 = vadd.f32 %v922_v0, %v921_v35 }
 0x1d5   :  { %s984_s2 = spop %983 }
 0x1d6   :  { %s824_s17 = smul.f32 0.00077160494, %s984_s2 }
 0x1d8   :  { %v825_v39 = vstv %s824_s17 }
 0x1d9   :  { %v826_v13 = vsub.f32 %v1608_v10, %v825_v39  ;;  %v827_v58 = vsub.f32 %v1603_v21, %v825_v39  ;;  %v828_v7 = vsub.f32 %v1614_v62, %v825_v39  ;;  %v829_v17 = vsub.f32 %v802_v30, %v825_v39 }
 0x1da   :  { %v830_v54 = vsub.f32 %v803_v45, %v825_v39  ;;  %v889_v30 = vrot.slane %v888_v25, 4 }
 0x1db   :  { %v831_v40 = vmul.f32 %v826_v13, %v826_v13  ;;  %v832_v26 = vmul.f32 %v827_v58, %v827_v58  ;;  %v833_v3 = vmul.f32 %v828_v7, %v828_v7  ;;  %v834_v55 = vmul.f32 %v829_v17, %v829_v17 }
 0x1dc   :  { %v835_v49 = vmul.f32 %v830_v54, %v830_v54  ;;  %v890_v20 = vadd.f32 %v889_v30, %v888_v25 }
 0x1dd   :  { %v836_v43 = vsel %vm804_vm4, %v831_v40, 0.0  ;;  %v837_v14 = vsel %vm804_vm4, %v832_v26, 0.0  ;;  %v839_v2 = vsel %vm804_vm4, %v833_v3, 0.0  ;;  %v841_v10 = vsel %vm804_vm4, %v834_v55, 0.0 }
 0x1de   :  { %v838_v27 = vadd.f32 %v837_v14, %v836_v43  ;;  %v843_v62 = vsel %vm812_vm5, %v835_v49, 0.0  ;;  %v891_v29 = vrot.slane %v890_v20, 2 }
 0x1e0   :  { %v840_v22 = vadd.f32 %v839_v2, %v838_v27  ;;  %v892_v15 = vadd.f32 %v891_v29, %v890_v20 }
 0x1e2   :  { %v842_v21 = vadd.f32 %v841_v10, %v840_v22  ;;  %v893_v1 = vrot.slane %v892_v15, 1 }
 0x1e4   :  { %v844_v37 = vadd.f32 %v843_v62, %v842_v21  ;;  %v894_v57 = vadd.f32 %v893_v1, %v892_v15 }
 0x1e6   :  { %845 = vadd.xlane.f32.xlu0 %v844_v37 }
 0x259   :  { %v846_v59 = vpop.xlane.xlu0 %845 }
 0x25a   :  { %v847_v12 = vrot.slane %v846_v59, 4 }
 0x25c   :  { %v848_v45 = vadd.f32 %v847_v12, %v846_v59 }
 0x25e   :  { %v849_v53 = vrot.slane %v848_v45, 2 }
 0x260   :  { %v850_v31 = vadd.f32 %v849_v53, %v848_v45 }
 0x262   :  { %v851_v16 = vrot.slane %v850_v31, 1 }
 0x264   :  { %v852_v33 = vadd.f32 %v851_v16, %v850_v31 }
 0x266   :  { %985 = vpush %v852_v33 }
 0x297   :  { %s986_s18 = spop %985 }
 0x298   :  { %s854_s19 = smul.f32 0.00077160494, %s986_s18 }
 0x29a   :  { %s855_s20 = sadd.f32 1e-05, %s854_s19 }
 0x29c   :  { %v856_v23 = vstv %s855_s20 }
 0x29d   :  { %998 = vrsqrt.f32 %v856_v23  ;;  %vm863_vm7 = vweird.f32 %v856_v23 }
 0x2a3   :  { %v999_v36 = vpop.eup %998 }
 0x2a4   :  { %v858_v11 = vmul.f32 %v999_v36, %v856_v23  ;;  %vm864_vm6 = vweird.f32 %v999_v36 }
 0x2a5   :  { %vm865_vm8 = vmor %vm863_vm7, %vm864_vm6 }
 0x2a6   :  { %v859_v46 = vmul.f32 %v999_v36, %v858_v11 }
 0x2a8   :  { %v860_v42 = vmul.f32 0.5, %v859_v46 }
 0x2aa   :  { %v861_v19 = vsub.f32 1.5, %v860_v42 }
 0x2ac   :  { %v862_v47 = vmul.f32 %v999_v36, %v861_v19 }
 0x2ae   :  { %v866_v34 = vsel %vm865_vm8, %v999_v36, %v862_v47 }
 0x2af   :  { %987 = vpush %v866_v34 }
 0x2b0   :  { %989 = vpush %v894_v57 }
 0x2b1   :  { %991 = vpush %v923_v24 }
 0x2e0   :  { %s988_s23 = spop %987 }
 0x2e1   :  { %s990_s24 = spop %989 }
 0x2e2   :  { %s925_s27 = smul.f32 %s990_s24, %s988_s23  ;;  %s992_s28 = spop %991 }
 0x2e3   :  { %s930_s29 = smul.f32 %s992_s28, %s988_s23 }
 0x2e4   :  { %s927_s30 = sadd.f32 %s981_s21, %s925_s27 }
 0x2e5   :  { %s932_s4 = sadd.f32 %s982_s22, %s930_s29 }
 0x2e6   :  { %929 = sst [smem:[#allocation5]] %s927_s30 }
 0x2e7   :  { %934 = sst [smem:[#allocation5 + $0x1]] %s932_s4 }
 0x2e8   :  { %943 = dma.smem_to_hbm %s1032_s5, 16, %s941_s26, [#allocation3]  }
 0x2e9   :  { %1026 = dma.done.wait [#allocation3], 16  }
 0x2ea   :  { %1027 = vsyncadd [#allocation3], 4294967280 }
 0x2eb   :  { %948 = sfence }
 0x2ec   :  { %949 = vsyncpa [#allocation3], 1 }
 0x2ed   :  { %950 = vsyncpa [#allocation4], 1 }

</bundles_post_ra>
